<compile_context>
chip_gen: v5e
topology: v5e:2x2
jax: 0.10.0
libtpu: 0.0.40
codegen_flags: <defaults>
</compile_context>

<pallas_src>
import functools

import jax
import jax.numpy as jnp
from jax.experimental import pallas as pl
from jax.experimental.pallas import tpu as pltpu


def _round_up(n, m):
    return ((n + m - 1) // m) * m


def _biclassifier_kernel(x_ref, w1_ref, b1_ref, w2_ref, b2_ref,
                         w3_ref, b3_ref, o_ref):
    # Layer 1: [tb, input_s](bf16) @ [input_s, 10](bf16) -> f32 acc, +b, tanh
    h1 = jnp.tanh(
        jnp.dot(x_ref[...], w1_ref[...], preferred_element_type=jnp.float32)
        + b1_ref[...])
    # Layer 2: [tb, 10] @ [10, 10]
    h2 = jnp.tanh(
        jnp.dot(h1.astype(jnp.bfloat16), w2_ref[...],
                preferred_element_type=jnp.float32)
        + b2_ref[...])
    # Layer 3: [tb, 10] @ [10, out_pad(=128k)] -> lane-dense store
    o_ref[...] = jnp.tanh(
        jnp.dot(h2.astype(jnp.bfloat16), w3_ref[...],
                preferred_element_type=jnp.float32)
        + b3_ref[...]).astype(o_ref.dtype)


@functools.partial(jax.jit, static_argnames=("tile_b",))
def biclassifier_forward(x, params, tile_b=512):
    """Fused BiClassifier forward pass.

    x: [B, input_s] float32
    params: dict with w1 [input_s,10], b1 [1,10], w2 [10,10], b2 [1,10],
            w3 [10,output_s], b3 [1,output_s]   (float32)
    """
    assert tile_b % 8 == 0, "tile_b must be a multiple of 8"

    w1, b1, w2, b2, w3, b3 = (params["w1"], params["b1"], params["w2"],
                              params["b2"], params["w3"], params["b3"])
    B, input_s = x.shape
    hidden = w1.shape[1]
    output_s = w3.shape[1]

    LANE = 128
    out_pad = _round_up(output_s, LANE)          # lane-dense output width

    # ---- effective batch tile: multiple of 8, capped by a conservative
    # ---- double-buffer VMEM budget (fits v7x's 32 MiB scoped default too).
    tb = min(tile_b, _round_up(B, 8))
    vmem_budget = 24 * 1024 * 1024               # bytes for 2x bf16 x-tiles
    while tb > 8 and 2 * tb * input_s * 2 > vmem_budget:
        tb = max(8, ((tb // 2) // 8) * 8)

    # ---- pad ragged batch with zero rows (sliced off after the kernel).
    B_pad = _round_up(B, tb)
    xb = x.astype(jnp.bfloat16)
    if B_pad != B:
        xb = jnp.pad(xb, ((0, B_pad - B), (0, 0)))

    # ---- zero-pad layer 3 to lane-dense 128 output columns.
    w3p = jnp.zeros((hidden, out_pad), w3.dtype).at[:, :output_s].set(w3)
    b3p = jnp.zeros((1, out_pad), b3.dtype).at[:, :output_s].set(b3)

    # ---- bf16 weight stream, f32 biases.
    w1b = w1.astype(jnp.bfloat16)
    w2b = w2.astype(jnp.bfloat16)
    w3b = w3p.astype(jnp.bfloat16)
    b1f = b1.astype(jnp.float32)
    b2f = b2.astype(jnp.float32)
    b3f = b3p.astype(jnp.float32)

    grid = (B_pad // tb,)

    # Weights/biases use full-extent blocks (constant block index), so they
    # stay resident in VMEM across grid steps — no per-step re-DMA.
    rep = lambda shape: pl.BlockSpec(shape, lambda i: (0, 0))

    out = pl.pallas_call(
        _biclassifier_kernel,
        out_shape=jax.ShapeDtypeStruct((B_pad, out_pad), jnp.float32),
        grid_spec=pltpu.PrefetchScalarGridSpec(
            num_scalar_prefetch=0,
            grid=grid,
            in_specs=[
                pl.BlockSpec((tb, input_s), lambda i: (i, 0)),   # x tile (bf16)
                rep((input_s, hidden)),    # w1
                rep((1, hidden)),          # b1
                rep((hidden, hidden)),     # w2
                rep((1, hidden)),          # b2
                rep((hidden, out_pad)),    # w3 (lane-dense padded)
                rep((1, out_pad)),         # b3 (lane-dense padded)
            ],
            out_specs=pl.BlockSpec((tb, out_pad), lambda i: (i, 0)),
        ),
        compiler_params=pltpu.CompilerParams(
            dimension_semantics=("parallel",),
            vmem_limit_bytes=32 * 1024 * 1024),
    )(xb, w1b, b1f, w2b, b2f, w3b, b3f)

    # Strip batch padding and the lane-padding columns.
    return out[:B, :output_s].astype(x.dtype)


def init_params(key, input_s, output_s, hidden=10, dtype=jnp.float32):
    """PyTorch-default-style init: U(-1/sqrt(fan_in), 1/sqrt(fan_in))."""
    ks = jax.random.split(key, 6)

    def uni(k, shape, fan_in):
        bound = 1.0 / jnp.sqrt(jnp.asarray(fan_in, dtype))
        return jax.random.uniform(k, shape, dtype, -bound, bound)

    return {
        "w1": uni(ks[0], (input_s, hidden), input_s),
        "b1": uni(ks[1], (1, hidden), input_s),
        "w2": uni(ks[2], (hidden, hidden), hidden),
        "b2": uni(ks[3], (1, hidden), hidden),
        "w3": uni(ks[4], (hidden, output_s), hidden),
        "b3": uni(ks[5], (1, output_s), hidden),
    }


def reference_forward(x, p):
    h1 = jnp.tanh(x @ p["w1"] + p["b1"])
    h2 = jnp.tanh(h1 @ p["w2"] + p["b2"])
    return jnp.tanh(h2 @ p["w3"] + p["b3"])


if __name__ == "__main__":
    key = jax.random.PRNGKey(0)
    k_x, k_p = jax.random.split(key)

    # Ragged batch (exercises zero-padding) with >=2 grid steps so v7x's
    # second TensorCore gets work.
    batch, input_s, output_s = 500, 32, 4
    x = jax.random.normal(k_x, (batch, input_s), jnp.float32)
    params = init_params(k_p, input_s, output_s)

    out = biclassifier_forward(x, params, tile_b=256)
    out = jax.block_until_ready(out)

    ref = reference_forward(x, params)
    assert out.shape == (batch, output_s)
    # bf16 input/weight stream -> relaxed tolerance vs the full-f32 reference.
    assert jnp.allclose(out, ref, atol=2e-2, rtol=2e-2), "mismatch vs reference"

    print("KERNEL_OK")
</pallas_src>

<mosaic_0001>
module attributes {stable_mosaic.version = 11 : i64} {
  func.func @_biclassifier_kernel(%arg0: i32, %arg1: memref<256x32xbf16, #tpu.memory_space<vmem>>, %arg2: memref<32x10xbf16, #tpu.memory_space<vmem>>, %arg3: memref<1x10xf32, #tpu.memory_space<vmem>>, %arg4: memref<10x10xbf16, #tpu.memory_space<vmem>>, %arg5: memref<1x10xf32, #tpu.memory_space<vmem>>, %arg6: memref<10x128xbf16, #tpu.memory_space<vmem>>, %arg7: memref<1x128xf32, #tpu.memory_space<vmem>>, %arg8: memref<256x128xf32, #tpu.memory_space<vmem>>) attributes {dimension_semantics = [#tpu.dimension_semantics<parallel>], iteration_bounds = array<i64: 2>, scalar_prefetch = 0 : i64, scratch_operands = 0 : i64, tpu.core_type = #tpu.core_type<tc>, window_params = [{transform_indices = @transform_0, window_bounds = array<i64: 256, 32>}, {pipeline_mode = #tpu.pipeline_mode<synchronous>, transform_indices = @transform_1, window_bounds = array<i64: 32, 10>}, {pipeline_mode = #tpu.pipeline_mode<synchronous>, transform_indices = @transform_2, window_bounds = array<i64: 1, 10>}, {pipeline_mode = #tpu.pipeline_mode<synchronous>, transform_indices = @transform_3, window_bounds = array<i64: 10, 10>}, {pipeline_mode = #tpu.pipeline_mode<synchronous>, transform_indices = @transform_4, window_bounds = array<i64: 1, 10>}, {pipeline_mode = #tpu.pipeline_mode<synchronous>, transform_indices = @transform_5, window_bounds = array<i64: 10, 128>}, {pipeline_mode = #tpu.pipeline_mode<synchronous>, transform_indices = @transform_6, window_bounds = array<i64: 1, 128>}, {transform_indices = @transform_7, window_bounds = array<i64: 256, 128>}]} {
    %c0 = arith.constant 0 : index
    %c0_0 = arith.constant 0 : index
    %0 = vector.load %arg1[%c0, %c0_0] : memref<256x32xbf16, #tpu.memory_space<vmem>>, vector<256x32xbf16>
    %c0_1 = arith.constant 0 : index
    %c0_2 = arith.constant 0 : index
    %1 = vector.load %arg2[%c0_1, %c0_2] : memref<32x10xbf16, #tpu.memory_space<vmem>>, vector<32x10xbf16>
    %cst = arith.constant dense<0.000000e+00> : vector<256x10xf32>
    %2 = tpu.matmul %0, %1, %cst {dimension_numbers = #tpu.dot_dimension_numbers<[1], [0], [0], [1], [0, 0, 1, 1], [], []>} : vector<256x32xbf16>, vector<32x10xbf16>, vector<256x10xf32> -> vector<256x10xf32>
    %c0_3 = arith.constant 0 : index
    %c0_4 = arith.constant 0 : index
    %3 = vector.load %arg3[%c0_3, %c0_4] : memref<1x10xf32, #tpu.memory_space<vmem>>, vector<1x10xf32>
    %4 = vector.broadcast %3 : vector<1x10xf32> to vector<256x10xf32>
    %5 = arith.addf %2, %4 : vector<256x10xf32>
    %6 = math.tanh %5 : vector<256x10xf32>
    %7 = arith.truncf %6 : vector<256x10xf32> to vector<256x10xbf16>
    %c0_5 = arith.constant 0 : index
    %c0_6 = arith.constant 0 : index
    %8 = vector.load %arg4[%c0_5, %c0_6] : memref<10x10xbf16, #tpu.memory_space<vmem>>, vector<10x10xbf16>
    %cst_7 = arith.constant dense<0.000000e+00> : vector<256x10xf32>
    %9 = tpu.matmul %7, %8, %cst_7 {dimension_numbers = #tpu.dot_dimension_numbers<[1], [0], [0], [1], [0, 0, 1, 1], [], []>} : vector<256x10xbf16>, vector<10x10xbf16>, vector<256x10xf32> -> vector<256x10xf32>
    %c0_8 = arith.constant 0 : index
    %c0_9 = arith.constant 0 : index
    %10 = vector.load %arg5[%c0_8, %c0_9] : memref<1x10xf32, #tpu.memory_space<vmem>>, vector<1x10xf32>
    %11 = vector.broadcast %10 : vector<1x10xf32> to vector<256x10xf32>
    %12 = arith.addf %9, %11 : vector<256x10xf32>
    %13 = math.tanh %12 : vector<256x10xf32>
    %14 = arith.truncf %13 : vector<256x10xf32> to vector<256x10xbf16>
    %c0_10 = arith.constant 0 : index
    %c0_11 = arith.constant 0 : index
    %15 = vector.load %arg6[%c0_10, %c0_11] : memref<10x128xbf16, #tpu.memory_space<vmem>>, vector<10x128xbf16>
    %cst_12 = arith.constant dense<0.000000e+00> : vector<256x128xf32>
    %16 = tpu.matmul %14, %15, %cst_12 {dimension_numbers = #tpu.dot_dimension_numbers<[1], [0], [0], [1], [0, 0, 1, 1], [], []>} : vector<256x10xbf16>, vector<10x128xbf16>, vector<256x128xf32> -> vector<256x128xf32>
    %c0_13 = arith.constant 0 : index
    %c0_14 = arith.constant 0 : index
    %17 = vector.load %arg7[%c0_13, %c0_14] : memref<1x128xf32, #tpu.memory_space<vmem>>, vector<1x128xf32>
    %18 = vector.broadcast %17 : vector<1x128xf32> to vector<256x128xf32>
    %19 = arith.addf %16, %18 : vector<256x128xf32>
    %20 = math.tanh %19 : vector<256x128xf32>
    %c0_15 = arith.constant 0 : index
    %c0_16 = arith.constant 0 : index
    %21 = vector.load %arg8[%c0_15, %c0_16] : memref<256x128xf32, #tpu.memory_space<vmem>>, vector<256x128xf32>
    tpu.vector_store %arg8[%c0_15, %c0_16], %20 {strides = array<i32>} : memref<256x128xf32, #tpu.memory_space<vmem>>, vector<256x128xf32>,
    return
  }
  func.func @transform_0(%arg0: i32) -> (i32, i32) {
    %c0_i32 = arith.constant 0 : i32
    %c0_i32_0 = arith.constant 0 : i32
    return %arg0, %c0_i32 : i32, i32
  }
  func.func @transform_1(%arg0: i32) -> (i32, i32) {
    %c0_i32 = arith.constant 0 : i32
    %c0_i32_0 = arith.constant 0 : i32
    %c0_i32_1 = arith.constant 0 : i32
    return %c0_i32, %c0_i32_0 : i32, i32
  }
  func.func @transform_2(%arg0: i32) -> (i32, i32) {
    %c0_i32 = arith.constant 0 : i32
    %c0_i32_0 = arith.constant 0 : i32
    %c0_i32_1 = arith.constant 0 : i32
    return %c0_i32, %c0_i32_0 : i32, i32
  }
  func.func @transform_3(%arg0: i32) -> (i32, i32) {
    %c0_i32 = arith.constant 0 : i32
    %c0_i32_0 = arith.constant 0 : i32
    %c0_i32_1 = arith.constant 0 : i32
    return %c0_i32, %c0_i32_0 : i32, i32
  }
  func.func @transform_4(%arg0: i32) -> (i32, i32) {
    %c0_i32 = arith.constant 0 : i32
    %c0_i32_0 = arith.constant 0 : i32
    %c0_i32_1 = arith.constant 0 : i32
    return %c0_i32, %c0_i32_0 : i32, i32
  }
  func.func @transform_5(%arg0: i32) -> (i32, i32) {
    %c0_i32 = arith.constant 0 : i32
    %c0_i32_0 = arith.constant 0 : i32
    %c0_i32_1 = arith.constant 0 : i32
    return %c0_i32, %c0_i32_0 : i32, i32
  }
  func.func @transform_6(%arg0: i32) -> (i32, i32) {
    %c0_i32 = arith.constant 0 : i32
    %c0_i32_0 = arith.constant 0 : i32
    %c0_i32_1 = arith.constant 0 : i32
    return %c0_i32, %c0_i32_0 : i32, i32
  }
  func.func @transform_7(%arg0: i32) -> (i32, i32) {
    %c0_i32 = arith.constant 0 : i32
    %c0_i32_0 = arith.constant 0 : i32
    return %arg0, %c0_i32 : i32, i32
  }
}

</mosaic_0001>

<bundles_post_ra>
// kernel: biclassifier_forward.1
= control target key start
LH: loop header
LB: loop body
LE: loop exit
PB: predicated region body
PF: predicated region fallthrough
CT: control target
= control target key end

     0   :  { %s1487_s24 = smov 0   ;;  %s1748_s0 = inlined_call_operand.vmem [shape: bf16[512,32], index: 0, kind: input, shape index: {}]   ;;  %s1749_s1 = inlined_call_operand.vmem [shape: bf16[32,10], index: 1, kind: input, shape index: {}]   ;;  %s1750_s2 = inlined_call_operand.vmem [shape: f32[1,10], index: 2, kind: input, shape index: {}]   ;;  %s1751_s3 = inlined_call_operand.vmem [shape: bf16[10,10], index: 3, kind: input, shape index: {}]   ;;  %s1752_s4 = inlined_call_operand.vmem [shape: f32[1,10], index: 4, kind: input, shape index: {}]   ;;  %s1753_s5 = inlined_call_operand.vmem [shape: bf16[10,128], index: 5, kind: input, shape index: {}]   ;;  %s1754_s6 = inlined_call_operand.vmem [shape: f32[1,128], index: 6, kind: input, shape index: {}]   ;;  %s1755_s7 = inlined_call_operand.vmem [shape: f32[512,128], index: 7, kind: output, shape index: {}]  }
   0x1 LB: > { %s1073_s25 = sadd.s32 4294967295, %s1445_s24   ;;  %p1077_p0 = scmp.ge.s32.totalorder %s1445_s24, 1  ;;  %s1445_s24 = sphi %s1487_s24, %s17_s24  }
   0x2   : > { %p238_p1 = scmp.lt.s32.totalorder %s1445_s24, 3 }
   0x4   : > { %p239_p2 = pnand %p1077_p0, %p238_p1 }
   0x5   : > { %s1078_s28 = sshll.u32 (!%p239_p2), %s1073_s25, 5 }
   0x6   : > { %242 = sbr.rel (%p239_p2) target bundleno = 651 (0x28b), region = 48  ;;  %p271_p3 = scmp.lt.s32.totalorder (!%p239_p2), %s1078_s28, 63 }
   0xb   : > { %v1229_v0 = vld [vmem:[%s1749_s1 + $0x8] sm:$0xff]  ;;  %v1228_v1 = vld [vmem:[%s1749_s1] sm:$0xff]  ;;  %s1757_s28 = smov (!%p271_p3, %s1078_s28), 63  ;;  %vm415_vm0 = vcmask 261120   ;;  %vm661_vm1 = vcmask 1044480   ;;  %vm612_vm2 = vcmask 80896  }
   0xc   : > { %470 = vmatpush.bf16.msra.mxu0 %v1229_v0  ;;  %1232 = vmatpush.bf16.msra.mxu3 %v1229_v0  ;;  %s1079_s8 = sshll.u32 %s1757_s28, 2  ;;  %v1172_v12 = vld [vmem:[%s1751_s3] sm:$0xf]  ;;  %v1230_v13 = vld [vmem:[%s1751_s3] sm:$0x10]  ;;  %s1081_s27 = sshll.u32 %s1757_s28, 3 }
   0xd   : > { %s1507_s11 = scalar_lea.vmem %s1748_s0, %s1079_s8  ;;  %v1173_v14 = vor.u32 %v1230_v13, %v1172_v12  ;;  %v1544_v20 = vld [vmem:[%s1750_s2] ss:$0 sm:$0xff]  ;;  %s1669_s8 = scalar_lea.vmem %s1755_s7, %s1081_s27 }
   0xe   : > { %v1212_v2 = vld [vmem:[%s1507_s11] sm:$0xff]  ;;  %v1213_v3 = vld [vmem:[%s1507_s11 + $0x8] sm:$0xff]  ;;  %v1214_v4 = vld [vmem:[%s1507_s11 + $0x10] sm:$0xff] }
   0xf   : > { %v1215_v5 = vld [vmem:[%s1507_s11 + $0x18] sm:$0xff]  ;;  %v1216_v6 = vld [vmem:[%s1507_s11 + $0x20] sm:$0xff]  ;;  %v1217_v8 = vld [vmem:[%s1507_s11 + $0x28] sm:$0xff]  ;;  %v663_v16 = vsel %vm661_vm1, %v1173_v14, 0 }
  0x10   : > { %471 = vmatpush.bf16.msra.mxu0 %v1228_v1  ;;  %1233 = vmatpush.bf16.msra.mxu3 %v1228_v1  ;;  %v1224_v7 = vld [vmem:[%s1507_s11 + $0x60] sm:$0xff]  ;;  %v1225_v9 = vld [vmem:[%s1507_s11 + $0x68] sm:$0xff]  ;;  %v1218_v10 = vld [vmem:[%s1507_s11 + $0x30] sm:$0xff] }
  0x11   : > { %v1226_v11 = vld [vmem:[%s1507_s11 + $0x70] sm:$0xff]  ;;  %v1219_v15 = vld [vmem:[%s1507_s11 + $0x38] sm:$0xff]  ;;  %672 = vmatpush.bf16.msra.mxu1 %v663_v16  ;;  %v1220_v18 = vld [vmem:[%s1507_s11 + $0x40] sm:$0xff] }
  0x12   : > { %v1227_v17 = vld [vmem:[%s1507_s11 + $0x78] sm:$0xff]  ;;  %v1221_v24 = vld [vmem:[%s1507_s11 + $0x48] sm:$0xff]  ;;  %v1222_v32 = vld [vmem:[%s1507_s11 + $0x50] sm:$0xff] }
  0x13   : > { %1154 = vmatmul.msk.bf16.vlgmr.msra.gmra.mxu0 %vm415_vm0, %v1212_v2  ;;  %1166 = vmatmul.msk.bf16.vlgmr.msra.gmra.mxu3 %vm415_vm0, %v1224_v7  ;;  %v1223_v40 = vld [vmem:[%s1507_s11 + $0x58] sm:$0xff] }
  0x14   : > { %1234 = vmatpush.bf16.msrb.mxu3 %v663_v16 }
  0x23   : > { %1155 = vmatmul.msk.bf16.gmra.mxu0 %vm415_vm0, %v1213_v3  ;;  %1167 = vmatmul.msk.bf16.gmra.mxu3 %vm415_vm0, %v1225_v9 }
  0x33   : > { %1156 = vmatmul.msk.bf16.gmra.mxu0 %vm415_vm0, %v1214_v4  ;;  %1168 = vmatmul.msk.bf16.gmra.mxu3 %vm415_vm0, %v1226_v11 }
  0x43   : > { %1157 = vmatmul.msk.bf16.gmra.mxu0 %vm415_vm0, %v1215_v5  ;;  %1169 = vmatmul.msk.bf16.gmra.mxu3 %vm415_vm0, %v1227_v17 }
  0x53   : > { %1158 = vmatmul.msk.bf16.gmra.mxu0 %vm415_vm0, %v1216_v6 }
  0x63   : > { %1159 = vmatmul.msk.bf16.gmra.mxu0 %vm415_vm0, %v1217_v8 }
  0x73   : > { %1160 = vmatmul.msk.bf16.gmra.mxu0 %vm415_vm0, %v1218_v10 }
  0x83   : > { %1161 = vmatmul.msk.bf16.gmra.mxu0 %vm415_vm0, %v1219_v15 }
  0x90   : > { %v473_v19 = vpop.f32.mrf.mxu0 }
  0x91   : > { %v474_v21 = vadd.f32 %v1544_v20, %v473_v19 }
  0x93   : > { %1162 = vmatmul.msk.bf16.gmra.mxu0 %vm415_vm0, %v1220_v18  ;;  %1247 = vtanh.f32 %v474_v21 }
  0x96   : > { %v533_v59 = vpop.f32.mrf.mxu3 }
  0x97   : > { %v534_v5 = vadd.f32 %v1544_v20, %v533_v59 }
  0x98   : > { %v475_v22 = vpop.f32.mrf.mxu0 }
  0x99   : > { %v476_v23 = vadd.f32 %v1544_v20, %v475_v22  ;;  %v1248_v25 = vpop.eup %1247 }
  0x9b   : > { %1249 = vtanh.f32 %v476_v23 }
  0x9e   : > { %v535_v63 = vpop.f32.mrf.mxu3 }
  0x9f   : > { %v536_v6 = vadd.f32 %v1544_v20, %v535_v63 }
  0xa0   : > { %v478_v26 = vpop.f32.mrf.mxu0 }
  0xa1   : > { %v1250_v27 = vpop.eup %1249  ;;  %v479_v29 = vadd.f32 %v1544_v20, %v478_v26 }
  0xa2   : > { %v585_v28 = vpack.c.bf16 %v1250_v27, %v1248_v25 }
  0xa3   : > { %1163 = vmatmul.msk.bf16.gmra.mxu0 %vm415_vm0, %v1221_v24  ;;  %1251 = vtanh.f32 %v479_v29 }
  0xa4   : > { %1174 = vmatmul.msk.bf16.vlgmr.msra.gmra.mxu1 %vm612_vm2, %v585_v28 }
  0xa6   : > { %v538_v4 = vpop.f32.mrf.mxu3 }
  0xa7   : > { %v539_v8 = vadd.f32 %v1544_v20, %v538_v4 }
  0xa8   : > { %v480_v30 = vpop.f32.mrf.mxu0 }
  0xa9   : > { %v481_v31 = vadd.f32 %v1544_v20, %v480_v30  ;;  %v1252_v33 = vpop.eup %1251 }
  0xab   : > { %1253 = vtanh.f32 %v481_v31  ;;  %v1192_v31 = vld [vmem:[%s1753_s5] sm:$0xf] }
  0xae   : > { %v540_v11 = vpop.f32.mrf.mxu3 }
  0xaf   : > { %v541_v12 = vadd.f32 %v1544_v20, %v540_v11 }
  0xb0   : > { %v483_v34 = vpop.f32.mrf.mxu0 }
  0xb1   : > { %v1254_v35 = vpop.eup %1253  ;;  %v484_v37 = vadd.f32 %v1544_v20, %v483_v34 }
  0xb2   : > { %v586_v36 = vpack.c.bf16 %v1254_v35, %v1252_v33 }
  0xb3   : > { %1164 = vmatmul.msk.bf16.gmra.mxu0 %vm415_vm0, %v1222_v32  ;;  %1255 = vtanh.f32 %v484_v37  ;;  %v1231_v32 = vld [vmem:[%s1753_s5] sm:$0x10] }
  0xb4   : > { %1175 = vmatmul.msk.bf16.gmra.mxu1 %vm612_vm2, %v586_v36  ;;  %v1193_v34 = vor.u32 %v1231_v32, %v1192_v31 }
  0xb6   : > { %v543_v21 = vpop.f32.mrf.mxu3 }
  0xb7   : > { %v544_v26 = vadd.f32 %v1544_v20, %v543_v21 }
  0xb8   : > { %v485_v38 = vpop.f32.mrf.mxu0 }
  0xb9   : > { %v486_v39 = vadd.f32 %v1544_v20, %v485_v38  ;;  %v1256_v41 = vpop.eup %1255  ;;  %v862_v38 = vsel %vm661_vm1, %v1193_v34, 0 }
  0xba   : > { %871 = vmatpush.bf16.msra.mxu2 %v862_v38  ;;  %1235 = vmatpush.bf16.msra.mxu3 %v862_v38 }
  0xbb   : > { %1257 = vtanh.f32 %v486_v39 }
  0xbe   : > { %v545_v29 = vpop.f32.mrf.mxu3 }
  0xbf   : > { %v546_v30 = vadd.f32 %v1544_v20, %v545_v29 }
  0xc0   : > { %v488_v42 = vpop.f32.mrf.mxu0 }
  0xc1   : > { %v1258_v43 = vpop.eup %1257  ;;  %v489_v45 = vadd.f32 %v1544_v20, %v488_v42 }
  0xc2   : > { %v587_v44 = vpack.c.bf16 %v1258_v43, %v1256_v41 }
  0xc3   : > { %1165 = vmatmul.msk.bf16.gmra.mxu0 %vm415_vm0, %v1223_v40  ;;  %1259 = vtanh.f32 %v489_v45 }
  0xc4   : > { %1176 = vmatmul.msk.bf16.gmra.mxu1 %vm612_vm2, %v587_v44 }
  0xc6   : > { %v548_v40 = vpop.f32.mrf.mxu3 }
  0xc7   : > { %v549_v44 = vadd.f32 %v1544_v20, %v548_v40 }
  0xc8   : > { %v490_v46 = vpop.f32.mrf.mxu0 }
  0xc9   : > { %v491_v47 = vadd.f32 %v1544_v20, %v490_v46  ;;  %v1260_v48 = vpop.eup %1259 }
  0xcb   : > { %1261 = vtanh.f32 %v491_v47 }
  0xce   : > { %v550_v47 = vpop.f32.mrf.mxu3 }
  0xd0   : > { %v493_v49 = vpop.f32.mrf.mxu0 }
  0xd1   : > { %v1262_v50 = vpop.eup %1261  ;;  %v494_v52 = vadd.f32 %v1544_v20, %v493_v49 }
  0xd2   : > { %v588_v51 = vpack.c.bf16 %v1262_v50, %v1260_v48  ;;  %v551_v48 = vadd.f32 %v1544_v20, %v550_v47 }
  0xd3   : > { %1263 = vtanh.f32 %v494_v52 }
  0xd4   : > { %1177 = vmatmul.msk.bf16.gmra.mxu1 %vm612_vm2, %v588_v51 }
  0xd8   : > { %v495_v53 = vpop.f32.mrf.mxu0 }
  0xd9   : > { %v496_v54 = vadd.f32 %v1544_v20, %v495_v53  ;;  %v1264_v55 = vpop.eup %1263 }
  0xdb   : > { %1265 = vtanh.f32 %v496_v54  ;;  %v1605_v54 = vld [vmem:[%s1752_s4] ss:$0 sm:$0xff] }
  0xe0   : > { %v498_v56 = vpop.f32.mrf.mxu0 }
  0xe1   : > { %v1266_v57 = vpop.eup %1265  ;;  %v499_v60 = vadd.f32 %v1544_v20, %v498_v56 }
  0xe2   : > { %v589_v58 = vpack.c.bf16 %v1266_v57, %v1264_v55 }
  0xe3   : > { %1267 = vtanh.f32 %v499_v60 }
  0xe4   : > { %1178 = vmatmul.msk.bf16.gmra.mxu1 %vm612_vm2, %v589_v58 }
  0xe8   : > { %v500_v61 = vpop.f32.mrf.mxu0 }
  0xe9   : > { %v501_v62 = vadd.f32 %v1544_v20, %v500_v61  ;;  %v1268_v0 = vpop.eup %1267 }
  0xeb   : > { %1269 = vtanh.f32 %v501_v62 }
  0xec   : > { %1271 = vtanh.f32 %v534_v5 }
  0xed   : > { %1273 = vtanh.f32 %v536_v6 }
  0xf0   : > { %v503_v1 = vpop.f32.mrf.mxu0 }
  0xf1   : > { %v1270_v2 = vpop.eup %1269  ;;  %v504_v7 = vadd.f32 %v1544_v20, %v503_v1 }
  0xf2   : > { %v590_v3 = vpack.c.bf16 %v1270_v2, %v1268_v0  ;;  %v1577_v13 = vpop.eup %1271 }
  0xf3   : > { %1275 = vtanh.f32 %v504_v7  ;;  %v1579_v14 = vpop.eup %1273 }
  0xf4   : > { %1179 = vmatmul.msk.bf16.gmra.mxu1 %vm612_vm2, %v590_v3  ;;  %1277 = vtanh.f32 %v539_v8  ;;  %v597_v24 = vpack.c.bf16 %v1579_v14, %v1577_v13 }
  0xf8   : > { %v505_v9 = vpop.f32.mrf.mxu0 }
  0xf9   : > { %v506_v10 = vadd.f32 %v1544_v20, %v505_v9  ;;  %v1276_v15 = vpop.eup %1275 }
  0xfa   : > { %v1278_v16 = vpop.eup %1277 }
  0xfb   : > { %1279 = vtanh.f32 %v506_v10 }
  0xfc   : > { %1281 = vtanh.f32 %v541_v12 }
 0x100   : > { %v508_v17 = vpop.f32.mrf.mxu0 }
 0x101   : > { %v1280_v18 = vpop.eup %1279  ;;  %v509_v25 = vadd.f32 %v1544_v20, %v508_v17 }
 0x102   : > { %v591_v19 = vpack.c.bf16 %v1280_v18, %v1276_v15  ;;  %v1282_v22 = vpop.eup %1281 }
 0x103   : > { %v598_v23 = vpack.c.bf16 %v1282_v22, %v1278_v16  ;;  %1283 = vtanh.f32 %v509_v25 }
 0x104   : > { %1180 = vmatmul.msk.bf16.gmra.mxu1 %vm612_vm2, %v591_v19  ;;  %1285 = vtanh.f32 %v544_v26 }
 0x105   : > { %1187 = vmatmul.msk.bf16.vlgmr.msrb.gmra.mxu3 %vm612_vm2, %v598_v23 }
 0x108   : > { %v510_v27 = vpop.f32.mrf.mxu0 }
 0x109   : > { %v511_v28 = vadd.f32 %v1544_v20, %v510_v27  ;;  %v1284_v33 = vpop.eup %1283 }
 0x10a   : > { %v1286_v35 = vpop.eup %1285 }
 0x10b   : > { %1287 = vtanh.f32 %v511_v28 }
 0x10c   : > { %1289 = vtanh.f32 %v546_v30 }
 0x110   : > { %v513_v36 = vpop.f32.mrf.mxu0 }
 0x111   : > { %v1288_v37 = vpop.eup %1287  ;;  %v514_v43 = vadd.f32 %v1544_v20, %v513_v36 }
 0x112   : > { %v592_v39 = vpack.c.bf16 %v1288_v37, %v1284_v33  ;;  %v1290_v41 = vpop.eup %1289 }
 0x113   : > { %v599_v42 = vpack.c.bf16 %v1290_v41, %v1286_v35  ;;  %1291 = vtanh.f32 %v514_v43 }
 0x114   : > { %1181 = vmatmul.msk.bf16.gmra.mxu1 %vm612_vm2, %v592_v39  ;;  %1293 = vtanh.f32 %v549_v44 }
 0x115   : > { %1188 = vmatmul.msk.bf16.gmra.mxu3 %vm612_vm2, %v599_v42 }
 0x118   : > { %v515_v45 = vpop.f32.mrf.mxu0 }
 0x119   : > { %v516_v46 = vadd.f32 %v1544_v20, %v515_v45  ;;  %v1292_v49 = vpop.eup %1291 }
 0x11a   : > { %v1294_v50 = vpop.eup %1293 }
 0x11b   : > { %1295 = vtanh.f32 %v516_v46 }
 0x11c   : > { %1297 = vtanh.f32 %v551_v48 }
 0x120   : > { %v518_v51 = vpop.f32.mrf.mxu0 }
 0x121   : > { %v1296_v52 = vpop.eup %1295  ;;  %v674_v53 = vpop.f32.mrf.mxu1  ;;  %v519_v58 = vadd.f32 %v1544_v20, %v518_v51 }
 0x122   : > { %v593_v55 = vpack.c.bf16 %v1296_v52, %v1292_v49  ;;  %v1298_v56 = vpop.eup %1297  ;;  %v675_v59 = vadd.f32 %v1605_v54, %v674_v53 }
 0x123   : > { %v600_v57 = vpack.c.bf16 %v1298_v56, %v1294_v50  ;;  %1299 = vtanh.f32 %v519_v58 }
 0x124   : > { %1182 = vmatmul.msk.bf16.gmra.mxu1 %vm612_vm2, %v593_v55  ;;  %1301 = vtanh.f32 %v675_v59 }
 0x125   : > { %1189 = vmatmul.msk.bf16.gmra.mxu3 %vm612_vm2, %v600_v57 }
 0x128   : > { %v520_v60 = vpop.f32.mrf.mxu0 }
 0x129   : > { %v521_v61 = vadd.f32 %v1544_v20, %v520_v60  ;;  %v676_v62 = vpop.f32.mrf.mxu1  ;;  %v1300_v0 = vpop.eup %1299 }
 0x12a   : > { %v677_v63 = vadd.f32 %v1605_v54, %v676_v62  ;;  %v1302_v1 = vpop.eup %1301 }
 0x12b   : > { %1303 = vtanh.f32 %v521_v61 }
 0x12c   : > { %1305 = vtanh.f32 %v677_v63 }
 0x130   : > { %v523_v2 = vpop.f32.mrf.mxu0 }
 0x131   : > { %v1304_v3 = vpop.eup %1303  ;;  %v679_v4 = vpop.f32.mrf.mxu1  ;;  %v524_v8 = vadd.f32 %v1544_v20, %v523_v2 }
 0x132   : > { %v1306_v5 = vpop.eup %1305  ;;  %v594_v6 = vpack.c.bf16 %v1304_v3, %v1300_v0  ;;  %v680_v9 = vadd.f32 %v1605_v54, %v679_v4 }
 0x133   : > { %v786_v7 = vpack.c.bf16 %v1306_v5, %v1302_v1  ;;  %1307 = vtanh.f32 %v524_v8 }
 0x134   : > { %1183 = vmatmul.msk.bf16.gmra.mxu1 %vm612_vm2, %v594_v6  ;;  %1309 = vtanh.f32 %v680_v9 }
 0x135   : > { %1194 = vmatmul.msk.bf16.vlgmr.msra.gmra.mxu2 %vm612_vm2, %v786_v7 }
 0x138   : > { %v525_v10 = vpop.f32.mrf.mxu0 }
 0x139   : > { %v526_v11 = vadd.f32 %v1544_v20, %v525_v10  ;;  %v681_v12 = vpop.f32.mrf.mxu1  ;;  %v1308_v16 = vpop.eup %1307 }
 0x13a   : > { %v682_v15 = vadd.f32 %v1605_v54, %v681_v12  ;;  %v1310_v17 = vpop.eup %1309 }
 0x13b   : > { %1311 = vtanh.f32 %v526_v11 }
 0x13c   : > { %1313 = vtanh.f32 %v682_v15 }
 0x140   : > { %v528_v18 = vpop.f32.mrf.mxu0 }
 0x141   : > { %v1312_v19 = vpop.eup %1311  ;;  %v684_v21 = vpop.f32.mrf.mxu1  ;;  %v529_v26 = vadd.f32 %v1544_v20, %v528_v18 }
 0x142   : > { %v1314_v22 = vpop.eup %1313  ;;  %v595_v23 = vpack.c.bf16 %v1312_v19, %v1308_v16  ;;  %v685_v27 = vadd.f32 %v1605_v54, %v684_v21 }
 0x143   : > { %v787_v25 = vpack.c.bf16 %v1314_v22, %v1310_v17  ;;  %1315 = vtanh.f32 %v529_v26 }
 0x144   : > { %1184 = vmatmul.msk.bf16.gmra.mxu1 %vm612_vm2, %v595_v23  ;;  %1317 = vtanh.f32 %v685_v27 }
 0x145   : > { %1195 = vmatmul.msk.bf16.gmra.mxu2 %vm612_vm2, %v787_v25 }
 0x148   : > { %v530_v28 = vpop.f32.mrf.mxu0 }
 0x149   : > { %v531_v29 = vadd.f32 %v1544_v20, %v530_v28  ;;  %v686_v30 = vpop.f32.mrf.mxu1  ;;  %v1316_v32 = vpop.eup %1315 }
 0x14a   : > { %v687_v31 = vadd.f32 %v1605_v54, %v686_v30  ;;  %v1318_v33 = vpop.eup %1317 }
 0x14b   : > { %1319 = vtanh.f32 %v531_v29 }
 0x14c   : > { %1321 = vtanh.f32 %v687_v31 }
 0x151   : > { %v1320_v34 = vpop.eup %1319  ;;  %v689_v35 = vpop.f32.mrf.mxu1 }
 0x152   : > { %v1322_v36 = vpop.eup %1321  ;;  %v596_v37 = vpack.c.bf16 %v1320_v34, %v1316_v32  ;;  %v690_v39 = vadd.f32 %v1605_v54, %v689_v35 }
 0x153   : > { %v788_v38 = vpack.c.bf16 %v1322_v36, %v1318_v33  ;;  %v1660_v36 = vld [vmem:[%s1754_s6] ss:$0 sm:$0xff] }
 0x154   : > { %1185 = vmatmul.msk.bf16.gmra.mxu1 %vm612_vm2, %v596_v37  ;;  %1323 = vtanh.f32 %v690_v39 }
 0x155   : > { %1196 = vmatmul.msk.bf16.gmra.mxu2 %vm612_vm2, %v788_v38 }
 0x159   : > { %v691_v20 = vpop.f32.mrf.mxu1 }
 0x15a   : > { %v692_v40 = vadd.f32 %v1605_v54, %v691_v20  ;;  %v1324_v41 = vpop.eup %1323 }
 0x15c   : > { %1325 = vtanh.f32 %v692_v40 }
 0x161   : > { %v694_v42 = vpop.f32.mrf.mxu1 }
 0x162   : > { %v1326_v43 = vpop.eup %1325  ;;  %v695_v45 = vadd.f32 %v1605_v54, %v694_v42 }
 0x163   : > { %v789_v44 = vpack.c.bf16 %v1326_v43, %v1324_v41 }
 0x164   : > { %1186 = vmatmul.msk.bf16.gmra.mxu1 %vm612_vm2, %v597_v24  ;;  %1327 = vtanh.f32 %v695_v45 }
 0x165   : > { %1197 = vmatmul.msk.bf16.gmra.mxu2 %vm612_vm2, %v789_v44 }
 0x169   : > { %v696_v46 = vpop.f32.mrf.mxu1 }
 0x16a   : > { %v697_v47 = vadd.f32 %v1605_v54, %v696_v46  ;;  %v1328_v48 = vpop.eup %1327 }
 0x16c   : > { %1329 = vtanh.f32 %v697_v47 }
 0x171   : > { %v699_v49 = vpop.f32.mrf.mxu1 }
 0x172   : > { %v1330_v50 = vpop.eup %1329  ;;  %v700_v52 = vadd.f32 %v1605_v54, %v699_v49 }
 0x173   : > { %v790_v51 = vpack.c.bf16 %v1330_v50, %v1328_v48 }
 0x174   : > { %1331 = vtanh.f32 %v700_v52 }
 0x175   : > { %1198 = vmatmul.msk.bf16.gmra.mxu2 %vm612_vm2, %v790_v51 }
 0x179   : > { %v701_v13 = vpop.f32.mrf.mxu1 }
 0x17a   : > { %v702_v14 = vadd.f32 %v1605_v54, %v701_v13  ;;  %v1332_v24 = vpop.eup %1331 }
 0x17c   : > { %1333 = vtanh.f32 %v702_v14 }
 0x181   : > { %v704_v53 = vpop.f32.mrf.mxu1 }
 0x182   : > { %v1334_v55 = vpop.eup %1333  ;;  %v705_v57 = vadd.f32 %v1605_v54, %v704_v53 }
 0x183   : > { %v791_v56 = vpack.c.bf16 %v1334_v55, %v1332_v24 }
 0x184   : > { %1335 = vtanh.f32 %v705_v57 }
 0x185   : > { %1199 = vmatmul.msk.bf16.gmra.mxu2 %vm612_vm2, %v791_v56 }
 0x188   : > { %v739_v59 = vpop.f32.mrf.mxu3 }
 0x189   : > { %v706_v58 = vpop.f32.mrf.mxu1  ;;  %v740_v61 = vadd.f32 %v1605_v54, %v739_v59 }
 0x18a   : > { %v707_v60 = vadd.f32 %v1605_v54, %v706_v58  ;;  %v1336_v62 = vpop.eup %1335 }
 0x18c   : > { %1337 = vtanh.f32 %v707_v60 }
 0x18d   : > { %1339 = vtanh.f32 %v740_v61 }
 0x190   : > { %v741_v0 = vpop.f32.mrf.mxu3 }
 0x191   : > { %v709_v63 = vpop.f32.mrf.mxu1  ;;  %v742_v2 = vadd.f32 %v1605_v54, %v741_v0 }
 0x192   : > { %v1338_v1 = vpop.eup %1337  ;;  %v710_v4 = vadd.f32 %v1605_v54, %v709_v63 }
 0x193   : > { %v792_v3 = vpack.c.bf16 %v1338_v1, %v1336_v62  ;;  %1341 = vtanh.f32 %v742_v2  ;;  %v1340_v5 = vpop.eup %1339 }
 0x194   : > { %1343 = vtanh.f32 %v710_v4 }
 0x195   : > { %1200 = vmatmul.msk.bf16.gmra.mxu2 %vm612_vm2, %v792_v3 }
 0x198   : > { %v744_v7 = vpop.f32.mrf.mxu3 }
 0x199   : > { %v711_v6 = vpop.f32.mrf.mxu1  ;;  %v1342_v9 = vpop.eup %1341  ;;  %v745_v17 = vadd.f32 %v1605_v54, %v744_v7 }
 0x19a   : > { %v712_v8 = vadd.f32 %v1605_v54, %v711_v6  ;;  %v799_v10 = vpack.c.bf16 %v1342_v9, %v1340_v5  ;;  %v1344_v11 = vpop.eup %1343 }
 0x19c   : > { %1345 = vtanh.f32 %v712_v8  ;;  %1207 = vmatmul.msk.bf16.vlgmr.msra.gmra.mxu3 %vm612_vm2, %v799_v10 }
 0x19d   : > { %1347 = vtanh.f32 %v745_v17 }
 0x1a0   : > { %v746_v15 = vpop.f32.mrf.mxu3 }
 0x1a1   : > { %v714_v12 = vpop.f32.mrf.mxu1  ;;  %v747_v18 = vadd.f32 %v1605_v54, %v746_v15 }
 0x1a2   : > { %v1346_v16 = vpop.eup %1345  ;;  %v715_v21 = vadd.f32 %v1605_v54, %v714_v12 }
 0x1a3   : > { %v793_v19 = vpack.c.bf16 %v1346_v16, %v1344_v11  ;;  %1349 = vtanh.f32 %v747_v18  ;;  %v1348_v26 = vpop.eup %1347 }
 0x1a4   : > { %1351 = vtanh.f32 %v715_v21 }
 0x1a5   : > { %1201 = vmatmul.msk.bf16.gmra.mxu2 %vm612_vm2, %v793_v19 }
 0x1a8   : > { %v749_v23 = vpop.f32.mrf.mxu3 }
 0x1a9   : > { %v716_v22 = vpop.f32.mrf.mxu1  ;;  %v1350_v27 = vpop.eup %1349  ;;  %v750_v33 = vadd.f32 %v1605_v54, %v749_v23 }
 0x1aa   : > { %v717_v25 = vadd.f32 %v1605_v54, %v716_v22  ;;  %v800_v28 = vpack.c.bf16 %v1350_v27, %v1348_v26  ;;  %v1352_v29 = vpop.eup %1351 }
 0x1ac   : > { %1353 = vtanh.f32 %v717_v25  ;;  %1208 = vmatmul.msk.bf16.gmra.mxu3 %vm612_vm2, %v800_v28 }
 0x1ad   : > { %1355 = vtanh.f32 %v750_v33 }
 0x1b0   : > { %v751_v31 = vpop.f32.mrf.mxu3 }
 0x1b1   : > { %v719_v30 = vpop.f32.mrf.mxu1  ;;  %v752_v34 = vadd.f32 %v1605_v54, %v751_v31 }
 0x1b2   : > { %v1354_v32 = vpop.eup %1353  ;;  %v720_v37 = vadd.f32 %v1605_v54, %v719_v30 }
 0x1b3   : > { %v794_v35 = vpack.c.bf16 %v1354_v32, %v1352_v29  ;;  %1357 = vtanh.f32 %v752_v34  ;;  %v1356_v41 = vpop.eup %1355 }
 0x1b4   : > { %1359 = vtanh.f32 %v720_v37 }
 0x1b5   : > { %1202 = vmatmul.msk.bf16.gmra.mxu2 %vm612_vm2, %v794_v35 }
 0x1b8   : > { %v873_v38 = vpop.f32.mrf.mxu2 }
 0x1b9   : > { %v874_v39 = vadd.f32 %v1660_v36, %v873_v38  ;;  %v721_v20 = vpop.f32.mrf.mxu1  ;;  %v1358_v42 = vpop.eup %1357 }
 0x1ba   : > { %v722_v40 = vadd.f32 %v1605_v54, %v721_v20  ;;  %v801_v43 = vpack.c.bf16 %v1358_v42, %v1356_v41  ;;  %v1360_v44 = vpop.eup %1359 }
 0x1bb   : > { %1361 = vtanh.f32 %v874_v39 }
 0x1bc   : > { %1363 = vtanh.f32 %v722_v40  ;;  %1209 = vmatmul.msk.bf16.gmra.mxu3 %vm612_vm2, %v801_v43 }
 0x1c0   : > { %v875_v45 = vpop.f32.mrf.mxu2 }
 0x1c1   : > { %v1362_v46 = vpop.eup %1361  ;;  %v876_v47 = vadd.f32 %v1660_v36, %v875_v45  ;;  %v724_v48 = vpop.f32.mrf.mxu1 }
 0x1c2   : > { %v1364_v49 = vpop.eup %1363  ;;  %985 = vst [vmem:[%s1669_s8] sm:$0xff] %v1362_v46  ;;  %v725_v51 = vadd.f32 %v1605_v54, %v724_v48 }
 0x1c3   : > { %1365 = vtanh.f32 %v876_v47  ;;  %v795_v50 = vpack.c.bf16 %v1364_v49, %v1360_v44 }
 0x1c4   : > { %1367 = vtanh.f32 %v725_v51 }
 0x1c5   : > { %1203 = vmatmul.msk.bf16.gmra.mxu2 %vm612_vm2, %v795_v50 }
 0x1c8   : > { %v878_v52 = vpop.f32.mrf.mxu2 }
 0x1c9   : > { %v1366_v13 = vpop.eup %1365  ;;  %v879_v14 = vadd.f32 %v1660_v36, %v878_v52  ;;  %v726_v24 = vpop.f32.mrf.mxu1 }
 0x1ca   : > { %986 = vst [vmem:[%s1669_s8 + $0x8] sm:$0xff] %v1366_v13  ;;  %v727_v53 = vadd.f32 %v1605_v54, %v726_v24  ;;  %v1368_v55 = vpop.eup %1367 }
 0x1cb   : > { %1369 = vtanh.f32 %v879_v14 }
 0x1cc   : > { %1371 = vtanh.f32 %v727_v53 }
 0x1d0   : > { %v880_v56 = vpop.f32.mrf.mxu2 }
 0x1d1   : > { %v1370_v57 = vpop.eup %1369  ;;  %v881_v58 = vadd.f32 %v1660_v36, %v880_v56  ;;  %v729_v59 = vpop.f32.mrf.mxu1 }
 0x1d2   : > { %v1372_v60 = vpop.eup %1371  ;;  %987 = vst [vmem:[%s1669_s8 + $0x10] sm:$0xff] %v1370_v57  ;;  %v730_v62 = vadd.f32 %v1605_v54, %v729_v59 }
 0x1d3   : > { %1373 = vtanh.f32 %v881_v58  ;;  %v796_v61 = vpack.c.bf16 %v1372_v60, %v1368_v55 }
 0x1d4   : > { %1375 = vtanh.f32 %v730_v62 }
 0x1d5   : > { %1204 = vmatmul.msk.bf16.gmra.mxu2 %vm612_vm2, %v796_v61 }
 0x1d8   : > { %v883_v63 = vpop.f32.mrf.mxu2 }
 0x1d9   : > { %v1374_v0 = vpop.eup %1373  ;;  %v884_v1 = vadd.f32 %v1660_v36, %v883_v63  ;;  %v731_v2 = vpop.f32.mrf.mxu1 }
 0x1da   : > { %988 = vst [vmem:[%s1669_s8 + $0x18] sm:$0xff] %v1374_v0  ;;  %v732_v3 = vadd.f32 %v1605_v54, %v731_v2  ;;  %v1376_v4 = vpop.eup %1375 }
 0x1db   : > { %1377 = vtanh.f32 %v884_v1 }
 0x1dc   : > { %1379 = vtanh.f32 %v732_v3 }
 0x1e0   : > { %v885_v5 = vpop.f32.mrf.mxu2 }
 0x1e1   : > { %v1378_v6 = vpop.eup %1377  ;;  %v886_v7 = vadd.f32 %v1660_v36, %v885_v5  ;;  %v734_v8 = vpop.f32.mrf.mxu1 }
 0x1e2   : > { %v1380_v9 = vpop.eup %1379  ;;  %989 = vst [vmem:[%s1669_s8 + $0x20] sm:$0xff] %v1378_v6  ;;  %v735_v11 = vadd.f32 %v1605_v54, %v734_v8 }
 0x1e3   : > { %1381 = vtanh.f32 %v886_v7  ;;  %v797_v10 = vpack.c.bf16 %v1380_v9, %v1376_v4 }
 0x1e4   : > { %1383 = vtanh.f32 %v735_v11 }
 0x1e5   : > { %1205 = vmatmul.msk.bf16.gmra.mxu2 %vm612_vm2, %v797_v10 }
 0x1e8   : > { %v888_v12 = vpop.f32.mrf.mxu2 }
 0x1e9   : > { %v1382_v15 = vpop.eup %1381  ;;  %v889_v16 = vadd.f32 %v1660_v36, %v888_v12  ;;  %v736_v17 = vpop.f32.mrf.mxu1 }
 0x1ea   : > { %990 = vst [vmem:[%s1669_s8 + $0x28] sm:$0xff] %v1382_v15  ;;  %v737_v18 = vadd.f32 %v1605_v54, %v736_v17  ;;  %v1384_v19 = vpop.eup %1383 }
 0x1eb   : > { %1385 = vtanh.f32 %v889_v16 }
 0x1ec   : > { %1387 = vtanh.f32 %v737_v18 }
 0x1f0   : > { %v890_v21 = vpop.f32.mrf.mxu2 }
 0x1f1   : > { %v1386_v22 = vpop.eup %1385  ;;  %v891_v23 = vadd.f32 %v1660_v36, %v890_v21 }
 0x1f2   : > { %v1388_v25 = vpop.eup %1387  ;;  %991 = vst [vmem:[%s1669_s8 + $0x30] sm:$0xff] %v1386_v22 }
 0x1f3   : > { %1389 = vtanh.f32 %v891_v23  ;;  %v798_v26 = vpack.c.bf16 %v1388_v25, %v1384_v19 }
 0x1f5   : > { %1206 = vmatmul.msk.bf16.gmra.mxu2 %vm612_vm2, %v798_v26 }
 0x1f8   : > { %v893_v27 = vpop.f32.mrf.mxu2 }
 0x1f9   : > { %v1390_v28 = vpop.eup %1389  ;;  %v894_v29 = vadd.f32 %v1660_v36, %v893_v27 }
 0x1fa   : > { %992 = vst [vmem:[%s1669_s8 + $0x38] sm:$0xff] %v1390_v28 }
 0x1fb   : > { %1391 = vtanh.f32 %v894_v29 }
 0x200   : > { %v895_v54 = vpop.f32.mrf.mxu2 }
 0x201   : > { %v1392_v30 = vpop.eup %1391  ;;  %v896_v31 = vadd.f32 %v1660_v36, %v895_v54 }
 0x202   : > { %993 = vst [vmem:[%s1669_s8 + $0x40] sm:$0xff] %v1392_v30 }
 0x203   : > { %1393 = vtanh.f32 %v896_v31 }
 0x208   : > { %v898_v32 = vpop.f32.mrf.mxu2 }
 0x209   : > { %v1394_v33 = vpop.eup %1393  ;;  %v899_v34 = vadd.f32 %v1660_v36, %v898_v32 }
 0x20a   : > { %994 = vst [vmem:[%s1669_s8 + $0x48] sm:$0xff] %v1394_v33 }
 0x20b   : > { %1395 = vtanh.f32 %v899_v34 }
 0x210   : > { %v900_v35 = vpop.f32.mrf.mxu2 }
 0x211   : > { %v1396_v37 = vpop.eup %1395  ;;  %v901_v38 = vadd.f32 %v1660_v36, %v900_v35 }
 0x212   : > { %995 = vst [vmem:[%s1669_s8 + $0x50] sm:$0xff] %v1396_v37 }
 0x213   : > { %1397 = vtanh.f32 %v901_v38 }
 0x218   : > { %v903_v39 = vpop.f32.mrf.mxu2 }
 0x219   : > { %v1398_v20 = vpop.eup %1397  ;;  %v904_v40 = vadd.f32 %v1660_v36, %v903_v39 }
 0x21a   : > { %996 = vst [vmem:[%s1669_s8 + $0x58] sm:$0xff] %v1398_v20 }
 0x21b   : > { %1399 = vtanh.f32 %v904_v40 }
 0x21f   : > { %v938_v44 = vpop.f32.mrf.mxu3 }
 0x220   : > { %v905_v41 = vpop.f32.mrf.mxu2  ;;  %v939_v48 = vadd.f32 %v1660_v36, %v938_v44 }
 0x221   : > { %v1400_v42 = vpop.eup %1399  ;;  %v906_v43 = vadd.f32 %v1660_v36, %v905_v41 }
 0x222   : > { %997 = vst [vmem:[%s1669_s8 + $0x60] sm:$0xff] %v1400_v42 }
 0x223   : > { %1401 = vtanh.f32 %v906_v43 }
 0x227   : > { %v940_v49 = vpop.f32.mrf.mxu3 }
 0x228   : > { %v908_v45 = vpop.f32.mrf.mxu2  ;;  %v941_v50 = vadd.f32 %v1660_v36, %v940_v49 }
 0x229   : > { %v1402_v46 = vpop.eup %1401  ;;  %v909_v47 = vadd.f32 %v1660_v36, %v908_v45 }
 0x22a   : > { %998 = vst [vmem:[%s1669_s8 + $0x68] sm:$0xff] %v1402_v46 }
 0x22b   : > { %1403 = vtanh.f32 %v909_v47 }
 0x22c   : > { %1405 = vtanh.f32 %v939_v48 }
 0x22d   : > { %1407 = vtanh.f32 %v941_v50 }
 0x22f   : > { %v943_v24 = vpop.f32.mrf.mxu3 }
 0x230   : > { %v910_v51 = vpop.f32.mrf.mxu2  ;;  %v944_v58 = vadd.f32 %v1660_v36, %v943_v24 }
 0x231   : > { %v1404_v52 = vpop.eup %1403  ;;  %v911_v13 = vadd.f32 %v1660_v36, %v910_v51 }
 0x232   : > { %v1406_v14 = vpop.eup %1405  ;;  %999 = vst [vmem:[%s1669_s8 + $0x70] sm:$0xff] %v1404_v52 }
 0x233   : > { %v1408_v53 = vpop.eup %1407  ;;  %1409 = vtanh.f32 %v911_v13  ;;  %1011 = vst [vmem:[%s1669_s8 + $0xd0] sm:$0xff] %v1406_v14 }
 0x234   : > { %1012 = vst [vmem:[%s1669_s8 + $0xd8] sm:$0xff] %v1408_v53 }
 0x237   : > { %v945_v59 = vpop.f32.mrf.mxu3 }
 0x238   : > { %v913_v55 = vpop.f32.mrf.mxu2  ;;  %v946_v60 = vadd.f32 %v1660_v36, %v945_v59 }
 0x239   : > { %v1410_v56 = vpop.eup %1409  ;;  %v914_v57 = vadd.f32 %v1660_v36, %v913_v55 }
 0x23a   : > { %1000 = vst [vmem:[%s1669_s8 + $0x78] sm:$0xff] %v1410_v56 }
 0x23b   : > { %1411 = vtanh.f32 %v914_v57 }
 0x23c   : > { %1413 = vtanh.f32 %v944_v58 }
 0x23d   : > { %1415 = vtanh.f32 %v946_v60 }
 0x23f   : > { %v948_v1 = vpop.f32.mrf.mxu3 }
 0x240   : > { %v915_v61 = vpop.f32.mrf.mxu2  ;;  %v949_v6 = vadd.f32 %v1660_v36, %v948_v1 }
 0x241   : > { %v1412_v62 = vpop.eup %1411  ;;  %v916_v63 = vadd.f32 %v1660_v36, %v915_v61 }
 0x242   : > { %v1414_v0 = vpop.eup %1413  ;;  %1001 = vst [vmem:[%s1669_s8 + $0x80] sm:$0xff] %v1412_v62 }
 0x243   : > { %v1416_v2 = vpop.eup %1415  ;;  %1417 = vtanh.f32 %v916_v63  ;;  %1013 = vst [vmem:[%s1669_s8 + $0xe0] sm:$0xff] %v1414_v0 }
 0x244   : > { %1014 = vst [vmem:[%s1669_s8 + $0xe8] sm:$0xff] %v1416_v2 }
 0x247   : > { %v950_v7 = vpop.f32.mrf.mxu3 }
 0x248   : > { %v918_v3 = vpop.f32.mrf.mxu2  ;;  %v951_v8 = vadd.f32 %v1660_v36, %v950_v7 }
 0x249   : > { %v1418_v4 = vpop.eup %1417  ;;  %v919_v5 = vadd.f32 %v1660_v36, %v918_v3 }
 0x24a   : > { %1002 = vst [vmem:[%s1669_s8 + $0x88] sm:$0xff] %v1418_v4 }
 0x24b   : > { %1419 = vtanh.f32 %v919_v5 }
 0x24c   : > { %1421 = vtanh.f32 %v949_v6 }
 0x24d   : > { %1423 = vtanh.f32 %v951_v8 }
 0x250   : > { %v920_v9 = vpop.f32.mrf.mxu2 }
 0x251   : > { %v1420_v10 = vpop.eup %1419  ;;  %v921_v11 = vadd.f32 %v1660_v36, %v920_v9 }
 0x252   : > { %v1422_v12 = vpop.eup %1421  ;;  %1003 = vst [vmem:[%s1669_s8 + $0x90] sm:$0xff] %v1420_v10 }
 0x253   : > { %v1424_v15 = vpop.eup %1423  ;;  %1425 = vtanh.f32 %v921_v11  ;;  %1015 = vst [vmem:[%s1669_s8 + $0xf0] sm:$0xff] %v1422_v12 }
 0x254   : > { %1016 = vst [vmem:[%s1669_s8 + $0xf8] sm:$0xff] %v1424_v15 }
 0x258   : > { %v923_v16 = vpop.f32.mrf.mxu2 }
 0x259   : > { %v1426_v17 = vpop.eup %1425  ;;  %v924_v18 = vadd.f32 %v1660_v36, %v923_v16 }
 0x25a   : > { %1004 = vst [vmem:[%s1669_s8 + $0x98] sm:$0xff] %v1426_v17 }
 0x25b   : > { %1427 = vtanh.f32 %v924_v18 }
 0x260   : > { %v925_v19 = vpop.f32.mrf.mxu2 }
 0x261   : > { %v1428_v21 = vpop.eup %1427  ;;  %v926_v22 = vadd.f32 %v1660_v36, %v925_v19 }
 0x262   : > { %1005 = vst [vmem:[%s1669_s8 + $0xa0] sm:$0xff] %v1428_v21 }
 0x263   : > { %1429 = vtanh.f32 %v926_v22 }
 0x268   : > { %v928_v23 = vpop.f32.mrf.mxu2 }
 0x269   : > { %v1430_v25 = vpop.eup %1429  ;;  %v929_v26 = vadd.f32 %v1660_v36, %v928_v23 }
 0x26a   : > { %1006 = vst [vmem:[%s1669_s8 + $0xa8] sm:$0xff] %v1430_v25 }
 0x26b   : > { %1431 = vtanh.f32 %v929_v26 }
 0x270   : > { %v930_v27 = vpop.f32.mrf.mxu2 }
 0x271   : > { %v1432_v28 = vpop.eup %1431  ;;  %v931_v29 = vadd.f32 %v1660_v36, %v930_v27 }
 0x272   : > { %1007 = vst [vmem:[%s1669_s8 + $0xb0] sm:$0xff] %v1432_v28 }
 0x273   : > { %1433 = vtanh.f32 %v931_v29 }
 0x278   : > { %v933_v54 = vpop.f32.mrf.mxu2 }
 0x279   : > { %v1434_v30 = vpop.eup %1433  ;;  %v934_v31 = vadd.f32 %v1660_v36, %v933_v54 }
 0x27a   : > { %1008 = vst [vmem:[%s1669_s8 + $0xb8] sm:$0xff] %v1434_v30 }
 0x27b   : > { %1435 = vtanh.f32 %v934_v31 }
 0x280   : > { %v935_v32 = vpop.f32.mrf.mxu2 }
 0x281   : > { %v1436_v33 = vpop.eup %1435  ;;  %v936_v34 = vadd.f32 %v1660_v36, %v935_v32 }
 0x282   : > { %1009 = vst [vmem:[%s1669_s8 + $0xc0] sm:$0xff] %v1436_v33 }
 0x283   : > { %1437 = vtanh.f32 %v936_v34 }
 0x289   : > { %v1438_v35 = vpop.eup %1437 }
 0x28a   : > { %1010 = vst [vmem:[%s1669_s8 + $0xc8] sm:$0xff] %v1438_v35 }
 0x28b PF: > { %s17_s24 = sadd.s32 1, %s1445_s24  }
 0x28c   : > { %p14_p4 = scmp.ge.s32.totalorder %s17_s24, 4  }
 0x28e   :  { %16 = sbr.rel (!%p14_p4) target bundleno = 1 (0x1), region = 78 }

</bundles_post_ra>
